<compile_context>
chip_gen: v7x
topology: tpu7x:2x2x1
jax: 0.10.0
libtpu: 0.0.40
codegen_flags: <defaults>
</compile_context>

<pallas_src>
import functools

import jax
import jax.numpy as jnp
from jax.experimental import pallas as pl
from jax.experimental.pallas import tpu as pltpu


def _round_up(a, m):
    return ((a + m - 1) // m) * m


def _transition_kernel(x_ref, g_ref, beta_ref, w1_ref, b1_ref, w2_ref, b2_ref,
                       o_ref, *, apply_layernorm, compute_dtype):
    """One grid step: (optional LayerNorm) -> Linear1 -> ReLU -> Linear2."""
    x = x_ref[...]

    if apply_layernorm:
        # LayerNorm over last dim (torch default eps=1e-5), f32 math.
        xf = x if x.dtype == jnp.float32 else x.astype(jnp.float32)
        mean = jnp.mean(xf, axis=-1, keepdims=True)
        ctr = xf - mean
        var = jnp.mean(ctr * ctr, axis=-1, keepdims=True)
        xn = ctr * jax.lax.rsqrt(var + 1e-5)
        xn = (xn * g_ref[...] + beta_ref[...]).astype(compute_dtype)
    else:
        # rm_layernorm=True: statically skip normalization; avoid the f32
        # widen + re-narrow round trip when x is already in compute_dtype.
        xn = x if x.dtype == compute_dtype else x.astype(compute_dtype)

    # MXU matmuls with bf16 operands (native rate on v5e/v6e/v7x), f32 acc.
    h = jnp.dot(xn, w1_ref[...], preferred_element_type=jnp.float32)
    h = jnp.maximum(h + b1_ref[...], 0.0)            # bias + ReLU in f32 (VPU)
    h = h.astype(compute_dtype)
    y = jnp.dot(h, w2_ref[...], preferred_element_type=jnp.float32)
    y = y + b2_ref[...]

    o_ref[...] = y.astype(o_ref.dtype)


_MAX_ROW_TILE = 16384


def _vmem_capacity_bytes():
    """Per-TensorCore VMEM capacity, generation-aware (conservative fallback)."""
    try:
        cap = int(pltpu.get_tpu_info().vmem_capacity_bytes)
        if cap > 0:
            return cap
    except Exception:   # info query only — never hides kernel errors
        pass
    try:
        kind = jax.devices()[0].device_kind.lower()
        if "v5" in kind or "v6" in kind:
            return 128 << 20                  # v5e / v6e: 128 MiB per TC
    except Exception:
        pass
    return 64 << 20                           # v7x-safe conservative default


def _vmem_estimate(row_tile, hidden, inner, in_bytes, out_bytes, w_bytes):
    est = 2 * row_tile * hidden * in_bytes            # x tile, double-buffered
    est += 2 * row_tile * hidden * out_bytes          # out tile, double-buffered
    est += 2 * 2 * hidden * inner * w_bytes           # w1 + w2, double-buffered
    est += 2 * (inner + 3 * hidden) * 4               # b1, b2, gamma, beta
    est += row_tile * inner * (4 + w_bytes)           # h: f32 acc + bf16 copy
    est += row_tile * hidden * (4 + w_bytes)          # LN f32 temp + xn bf16 copy
    return est


def transition_forward(x, params, *, rm_layernorm=False, row_tile=2048,
                       compute_dtype=jnp.bfloat16, out_dtype=None):
    """Applies the Transition block to x of shape [..., hidden]."""
    orig_shape = x.shape
    hidden = orig_shape[-1]
    inner = params["w1"].shape[1]
    out_dtype = x.dtype if out_dtype is None else out_dtype

    if not rm_layernorm and ("ln_gamma" not in params or "ln_beta" not in params):
        raise ValueError(
            "rm_layernorm=False requires 'ln_gamma' and 'ln_beta' in params")

    x2d = x.reshape(-1, hidden)
    rows = x2d.shape[0]

    in_bytes = x2d.dtype.itemsize
    w_bytes = jnp.dtype(compute_dtype).itemsize
    out_bytes = jnp.dtype(out_dtype).itemsize

    vmem_cap = _vmem_capacity_bytes()
    tile_budget = int(0.70 * vmem_cap)   # ~45 MiB on v7x, ~90 MiB on v5e/v6e

    est = functools.partial(_vmem_estimate, hidden=hidden, inner=inner,
                            in_bytes=in_bytes, out_bytes=out_bytes,
                            w_bytes=w_bytes)

    # --- row-tile selection (grow-to-fit) -----------------------------------
    align = 128 if rows >= 128 else 8         # 128-aligned M keeps MXU passes full
    rows_rounded = _round_up(rows, align)
    # Keep >=2 grid steps when there is enough work (v7x has 2 TCs per chip).
    two_step_cap = _round_up(pl.cdiv(rows, 2), align) if rows >= 256 else rows_rounded
    row_cap = min(rows_rounded, two_step_cap, _MAX_ROW_TILE)

    row_tile = max(8, min(_round_up(int(row_tile), align), row_cap))
    # Grow toward the VMEM budget: amortizes the ~600-cycle per-step overhead
    # and keeps the x/out DMAs large.
    while 2 * row_tile <= row_cap and est(2 * row_tile) <= tile_budget:
        row_tile *= 2
    # Shrink only if even the starting tile blows the budget (huge hidden/inner).
    while row_tile > 8 and est(row_tile) > tile_budget:
        row_tile = max(8, _round_up(row_tile // 2, 8))
    # TODO(synk): at production inner sizes (>=2K) where the h-term dominates
    # the estimate, tile the inner dimension in-kernel (f32 accumulator)
    # instead of shrinking row_tile.

    grid = (pl.cdiv(rows, row_tile),)

    # Constant operands (broadcast along the grid; tiny, double-buffered).
    if rm_layernorm:
        gamma = jnp.ones((1, hidden), jnp.float32)    # unused (static branch)
        beta = jnp.zeros((1, hidden), jnp.float32)
    else:
        gamma = params["ln_gamma"].astype(jnp.float32).reshape(1, hidden)
        beta = params["ln_beta"].astype(jnp.float32).reshape(1, hidden)
    w1 = params["w1"].astype(compute_dtype)           # bf16 weights: half DMA/VMEM
    w2 = params["w2"].astype(compute_dtype)
    b1 = params["b1"].astype(jnp.float32).reshape(1, inner)
    b2 = params["b2"].astype(jnp.float32).reshape(1, hidden)

    kernel = functools.partial(_transition_kernel,
                               apply_layernorm=not rm_layernorm,
                               compute_dtype=compute_dtype)

    vmem_limit = int(min(max(int(1.5 * est(row_tile)), 32 << 20),
                         int(0.85 * vmem_cap)))
    cost = pl.CostEstimate(
        flops=4 * rows * hidden * inner,                       # two matmuls
        transcendentals=(0 if rm_layernorm else rows),         # rsqrt / row
        bytes_accessed=(rows * hidden * (in_bytes + out_bytes)
                        + 2 * hidden * inner * w_bytes
                        + (inner + 3 * hidden) * 4))

    _const_map = lambda i: (0, 0)
    _row_map = lambda i: (i, 0)

    out2d = pl.pallas_call(
        kernel,
        out_shape=jax.ShapeDtypeStruct((rows, hidden), out_dtype),
        grid_spec=pltpu.PrefetchScalarGridSpec(
            num_scalar_prefetch=0,
            grid=grid,
            in_specs=[
                pl.BlockSpec((row_tile, hidden), _row_map),     # x tile
                pl.BlockSpec((1, hidden), _const_map),          # gamma
                pl.BlockSpec((1, hidden), _const_map),          # beta
                pl.BlockSpec((hidden, inner), _const_map),      # w1
                pl.BlockSpec((1, inner), _const_map),           # b1
                pl.BlockSpec((inner, hidden), _const_map),      # w2
                pl.BlockSpec((1, hidden), _const_map),          # b2
            ],
            # Module default hidden_dim=128 => lane-dense output stores.
            # TODO(synk): for hidden < 128 a wrapper-side repack to a 128-lane
            # slab would avoid masked stores.
            out_specs=pl.BlockSpec((row_tile, hidden), _row_map),
        ),
        compiler_params=pltpu.CompilerParams(
            dimension_semantics=("parallel",),
            vmem_limit_bytes=vmem_limit),
        cost_estimate=cost,
    )(x2d, gamma, beta, w1, b1, w2, b2)

    return out2d.reshape(orig_shape[:-1] + (hidden,))


def init_transition_params(key, hidden_dim=128, n=4):
    """Deterministic synthetic parameters matching torch shapes.

    torch Linear(in, out) has weight [out, in]; we store the transpose
    [in, out] so the kernel computes x @ W + b directly.
    """
    inner = n * hidden_dim
    k1, k2, k3, k4 = jax.random.split(key, 4)
    bound1 = 1.0 / jnp.sqrt(hidden_dim)
    bound2 = 1.0 / jnp.sqrt(inner)
    return {
        "ln_gamma": jnp.ones((hidden_dim,), jnp.float32),
        "ln_beta": jnp.zeros((hidden_dim,), jnp.float32),
        "w1": jax.random.uniform(k1, (hidden_dim, inner), jnp.float32,
                                 -bound1, bound1),
        "b1": jax.random.uniform(k2, (inner,), jnp.float32, -bound1, bound1),
        "w2": jax.random.uniform(k3, (inner, hidden_dim), jnp.float32,
                                 -bound2, bound2),
        "b2": jax.random.uniform(k4, (hidden_dim,), jnp.float32,
                                 -bound2, bound2),
    }


def _reference(x, p, *, rm_layernorm=False, compute_dtype=jnp.bfloat16):
    """Pure-JAX reference mirroring the kernel's bf16-operand matmuls."""
    xf = x.astype(jnp.float32)
    if not rm_layernorm:
        mean = jnp.mean(xf, axis=-1, keepdims=True)
        var = jnp.mean((xf - mean) ** 2, axis=-1, keepdims=True)
        xf = (xf - mean) / jnp.sqrt(var + 1e-5) * p["ln_gamma"] + p["ln_beta"]
    xn = xf.astype(compute_dtype)
    h = jnp.dot(xn, p["w1"].astype(compute_dtype),
                preferred_element_type=jnp.float32) + p["b1"]
    h = jnp.maximum(h, 0.0).astype(compute_dtype)
    y = jnp.dot(h, p["w2"].astype(compute_dtype),
                preferred_element_type=jnp.float32) + p["b2"]
    return y


if __name__ == "__main__":
    key = jax.random.PRNGKey(0)
    kx, kp, kx2 = jax.random.split(key, 3)

    hidden, n = 128, 4                     # module defaults (hidden_dim=128, n=4)
    params = init_transition_params(kp, hidden_dim=hidden, n=n)

    # Small canonical case (batch=2, seq=8, hidden=128), arbitrary leading dims.
    batch, seq = 2, 8
    x = jax.random.normal(kx, (batch, seq, hidden), jnp.float32)
    out = jax.block_until_ready(transition_forward(x, params))
    ref = _reference(x, params)
    assert out.shape == x.shape
    assert jnp.allclose(out, ref, atol=5e-3, rtol=5e-3), "mismatch (layernorm path)"

    # Ragged row count + multi-step grid (exercises boundary blocks, 2 steps).
    x_big = jax.random.normal(kx2, (1000, hidden), jnp.float32)
    out_big = jax.block_until_ready(transition_forward(x_big, params))
    ref_big = _reference(x_big, params)
    assert jnp.allclose(out_big, ref_big, atol=5e-3, rtol=5e-3), "mismatch (ragged)"

    # rm_layernorm path: normalization is statically removed inside the kernel.
    out_rm = jax.block_until_ready(
        transition_forward(x, params, rm_layernorm=True))
    ref_rm = _reference(x, params, rm_layernorm=True)
    assert jnp.allclose(out_rm, ref_rm, atol=5e-3, rtol=5e-3), "mismatch (rm_layernorm)"

    print("KERNEL_OK")
</pallas_src>

<mosaic_0001>
module attributes {stable_mosaic.version = 11 : i64} {
  func.func @_transition_kernel(%arg0: i32, %arg1: memref<16x128xf32, #tpu.memory_space<vmem>>, %arg2: memref<1x128xf32, #tpu.memory_space<vmem>>, %arg3: memref<1x128xf32, #tpu.memory_space<vmem>>, %arg4: memref<128x512xbf16, #tpu.memory_space<vmem>>, %arg5: memref<1x512xf32, #tpu.memory_space<vmem>>, %arg6: memref<512x128xbf16, #tpu.memory_space<vmem>>, %arg7: memref<1x128xf32, #tpu.memory_space<vmem>>, %arg8: memref<16x128xf32, #tpu.memory_space<vmem>>) attributes {dimension_semantics = [#tpu.dimension_semantics<parallel>], iteration_bounds = array<i64: 1>, scalar_prefetch = 0 : i64, scratch_operands = 0 : i64, tpu.core_type = #tpu.core_type<tc>, window_params = [{transform_indices = @transform_0, window_bounds = array<i64: 16, 128>}, {pipeline_mode = #tpu.pipeline_mode<synchronous>, transform_indices = @transform_1, window_bounds = array<i64: 1, 128>}, {pipeline_mode = #tpu.pipeline_mode<synchronous>, transform_indices = @transform_2, window_bounds = array<i64: 1, 128>}, {pipeline_mode = #tpu.pipeline_mode<synchronous>, transform_indices = @transform_3, window_bounds = array<i64: 128, 512>}, {pipeline_mode = #tpu.pipeline_mode<synchronous>, transform_indices = @transform_4, window_bounds = array<i64: 1, 512>}, {pipeline_mode = #tpu.pipeline_mode<synchronous>, transform_indices = @transform_5, window_bounds = array<i64: 512, 128>}, {pipeline_mode = #tpu.pipeline_mode<synchronous>, transform_indices = @transform_6, window_bounds = array<i64: 1, 128>}, {transform_indices = @transform_7, window_bounds = array<i64: 16, 128>}]} {
    %c0 = arith.constant 0 : index
    %c0_0 = arith.constant 0 : index
    %0 = vector.load %arg1[%c0, %c0_0] : memref<16x128xf32, #tpu.memory_space<vmem>>, vector<16x128xf32>
    %cst = arith.constant dense<0.000000e+00> : vector<16xf32>
    %1 = vector.multi_reduction <add>, %0, %cst [1] : vector<16x128xf32> to vector<16xf32>
    %2 = vector.shape_cast %1 : vector<16xf32> to vector<16x1xf32>
    %cst_1 = arith.constant 1.280000e+02 : f32
    %3 = vector.broadcast %cst_1 : f32 to vector<16x1xf32>
    %4 = arith.divf %2, %3 : vector<16x1xf32>
    %5 = vector.broadcast %4 : vector<16x1xf32> to vector<16x128xf32>
    %6 = arith.subf %0, %5 : vector<16x128xf32>
    %7 = arith.mulf %6, %6 : vector<16x128xf32>
    %cst_2 = arith.constant dense<0.000000e+00> : vector<16xf32>
    %8 = vector.multi_reduction <add>, %7, %cst_2 [1] : vector<16x128xf32> to vector<16xf32>
    %9 = vector.shape_cast %8 : vector<16xf32> to vector<16x1xf32>
    %cst_3 = arith.constant 1.280000e+02 : f32
    %10 = vector.broadcast %cst_3 : f32 to vector<16x1xf32>
    %11 = arith.divf %9, %10 : vector<16x1xf32>
    %cst_4 = arith.constant 9.99999974E-6 : f32
    %12 = vector.broadcast %cst_4 : f32 to vector<16x1xf32>
    %13 = arith.addf %11, %12 : vector<16x1xf32>
    %14 = math.rsqrt %13 : vector<16x1xf32>
    %15 = vector.broadcast %14 : vector<16x1xf32> to vector<16x128xf32>
    %16 = arith.mulf %6, %15 : vector<16x128xf32>
    %c0_5 = arith.constant 0 : index
    %c0_6 = arith.constant 0 : index
    %17 = vector.load %arg2[%c0_5, %c0_6] : memref<1x128xf32, #tpu.memory_space<vmem>>, vector<1x128xf32>
    %18 = vector.broadcast %17 : vector<1x128xf32> to vector<16x128xf32>
    %19 = arith.mulf %16, %18 : vector<16x128xf32>
    %c0_7 = arith.constant 0 : index
    %c0_8 = arith.constant 0 : index
    %20 = vector.load %arg3[%c0_7, %c0_8] : memref<1x128xf32, #tpu.memory_space<vmem>>, vector<1x128xf32>
    %21 = vector.broadcast %20 : vector<1x128xf32> to vector<16x128xf32>
    %22 = arith.addf %19, %21 : vector<16x128xf32>
    %23 = arith.truncf %22 : vector<16x128xf32> to vector<16x128xbf16>
    %c0_9 = arith.constant 0 : index
    %c0_10 = arith.constant 0 : index
    %24 = vector.load %arg4[%c0_9, %c0_10] : memref<128x512xbf16, #tpu.memory_space<vmem>>, vector<128x512xbf16>
    %cst_11 = arith.constant dense<0.000000e+00> : vector<16x512xf32>
    %25 = tpu.matmul %23, %24, %cst_11 {dimension_numbers = #tpu.dot_dimension_numbers<[1], [0], [0], [1], [0, 0, 1, 1], [], []>} : vector<16x128xbf16>, vector<128x512xbf16>, vector<16x512xf32> -> vector<16x512xf32>
    %c0_12 = arith.constant 0 : index
    %c0_13 = arith.constant 0 : index
    %26 = vector.load %arg5[%c0_12, %c0_13] : memref<1x512xf32, #tpu.memory_space<vmem>>, vector<1x512xf32>
    %27 = vector.broadcast %26 : vector<1x512xf32> to vector<16x512xf32>
    %28 = arith.addf %25, %27 : vector<16x512xf32>
    %cst_14 = arith.constant 0.000000e+00 : f32
    %29 = vector.broadcast %cst_14 : f32 to vector<16x512xf32>
    %30 = arith.maximumf %28, %29 : vector<16x512xf32>
    %31 = arith.truncf %30 : vector<16x512xf32> to vector<16x512xbf16>
    %c0_15 = arith.constant 0 : index
    %c0_16 = arith.constant 0 : index
    %32 = vector.load %arg6[%c0_15, %c0_16] : memref<512x128xbf16, #tpu.memory_space<vmem>>, vector<512x128xbf16>
    %cst_17 = arith.constant dense<0.000000e+00> : vector<16x128xf32>
    %33 = tpu.matmul %31, %32, %cst_17 {dimension_numbers = #tpu.dot_dimension_numbers<[1], [0], [0], [1], [0, 0, 1, 1], [], []>} : vector<16x512xbf16>, vector<512x128xbf16>, vector<16x128xf32> -> vector<16x128xf32>
    %c0_18 = arith.constant 0 : index
    %c0_19 = arith.constant 0 : index
    %34 = vector.load %arg7[%c0_18, %c0_19] : memref<1x128xf32, #tpu.memory_space<vmem>>, vector<1x128xf32>
    %35 = vector.broadcast %34 : vector<1x128xf32> to vector<16x128xf32>
    %36 = arith.addf %33, %35 : vector<16x128xf32>
    %c0_20 = arith.constant 0 : index
    %c0_21 = arith.constant 0 : index
    %37 = vector.load %arg8[%c0_20, %c0_21] : memref<16x128xf32, #tpu.memory_space<vmem>>, vector<16x128xf32>
    tpu.vector_store %arg8[%c0_20, %c0_21], %36 {strides = array<i32>} : memref<16x128xf32, #tpu.memory_space<vmem>>, vector<16x128xf32>,
    return
  }
  func.func @transform_0(%arg0: i32) -> (i32, i32) {
    %c0_i32 = arith.constant 0 : i32
    %c0_i32_0 = arith.constant 0 : i32
    return %arg0, %c0_i32 : i32, i32
  }
  func.func @transform_1(%arg0: i32) -> (i32, i32) {
    %c0_i32 = arith.constant 0 : i32
    %c0_i32_0 = arith.constant 0 : i32
    %c0_i32_1 = arith.constant 0 : i32
    return %c0_i32, %c0_i32_0 : i32, i32
  }
  func.func @transform_2(%arg0: i32) -> (i32, i32) {
    %c0_i32 = arith.constant 0 : i32
    %c0_i32_0 = arith.constant 0 : i32
    %c0_i32_1 = arith.constant 0 : i32
    return %c0_i32, %c0_i32_0 : i32, i32
  }
  func.func @transform_3(%arg0: i32) -> (i32, i32) {
    %c0_i32 = arith.constant 0 : i32
    %c0_i32_0 = arith.constant 0 : i32
    %c0_i32_1 = arith.constant 0 : i32
    return %c0_i32, %c0_i32_0 : i32, i32
  }
  func.func @transform_4(%arg0: i32) -> (i32, i32) {
    %c0_i32 = arith.constant 0 : i32
    %c0_i32_0 = arith.constant 0 : i32
    %c0_i32_1 = arith.constant 0 : i32
    return %c0_i32, %c0_i32_0 : i32, i32
  }
  func.func @transform_5(%arg0: i32) -> (i32, i32) {
    %c0_i32 = arith.constant 0 : i32
    %c0_i32_0 = arith.constant 0 : i32
    %c0_i32_1 = arith.constant 0 : i32
    return %c0_i32, %c0_i32_0 : i32, i32
  }
  func.func @transform_6(%arg0: i32) -> (i32, i32) {
    %c0_i32 = arith.constant 0 : i32
    %c0_i32_0 = arith.constant 0 : i32
    %c0_i32_1 = arith.constant 0 : i32
    return %c0_i32, %c0_i32_0 : i32, i32
  }
  func.func @transform_7(%arg0: i32) -> (i32, i32) {
    %c0_i32 = arith.constant 0 : i32
    %c0_i32_0 = arith.constant 0 : i32
    return %arg0, %c0_i32 : i32, i32
  }
}

</mosaic_0001>

<bundles_post_ra>
// kernel: tpu_custom_call.1
= control target key start
LH: loop header
LB: loop body
LE: loop exit
PB: predicated region body
PF: predicated region fallthrough
CT: control target
= control target key end

     0   :  { %12 = vsyncpa [#allocation3], 0  ;;  %s1217_s0 = inlined_call_operand.hbm [shape: f32[16,128], index: 0, kind: input, shape index: {}]   ;;  %s1218_s1 = inlined_call_operand.vmem [shape: f32[1,128], index: 1, kind: input, shape index: {}]   ;;  %s1219_s2 = inlined_call_operand.vmem [shape: f32[1,128], index: 2, kind: input, shape index: {}]   ;;  %s1220_s3 = inlined_call_operand.hbm [shape: bf16[128,512], index: 3, kind: input, shape index: {}]   ;;  %s1221_s4 = inlined_call_operand.vmem [shape: f32[1,512], index: 4, kind: input, shape index: {}]   ;;  %s1222_s5 = inlined_call_operand.hbm [shape: bf16[512,128], index: 5, kind: input, shape index: {}]   ;;  %s1223_s6 = inlined_call_operand.vmem [shape: f32[1,128], index: 6, kind: input, shape index: {}]   ;;  %s1224_s7 = inlined_call_operand.hbm [shape: f32[16,128], index: 7, kind: output, shape index: {}]  }
   0x1   :  { %13 = vsyncpa [#allocation6], 0 }
   0x2   :  { %14 = vsyncpa [#allocation4], 0  ;;  %s1090_s24 = smov [#allocation5]   ;;  %s996_s28 = scalar_lea.hbm %s1220_s3, 4096 }
   0x3   :  { %s36_s25 = sshll.u32 %s1090_s24, 4  ;;  %p997_p0 = scmp.ne.s32.totalorder %s1220_s3, %s996_s28  ;;  %s37_s25 = int_to_ptr.vmem [resolvable:$true] %s36_s25 }
   0x4   :  { %p1000_p1 = scmp.lt.u32.totalorder %s996_s28, %s1220_s3 }
   0x6   :  { %p1002_p2 = pnand %p1000_p1, %p997_p0 }
   0x8   :  { %1005 = shalt.err (!%p1002_p2)
}
   0x9   :  { %s1006_s10 = scalar_lea.vmem %s37_s25, 4096  ;;  %p1011_p4 = scmp.lt.s32.totalorder %s37_s25, %s37_s25 }
   0xa   :  { %p1007_p3 = scmp.ne.s32.totalorder %s37_s25, %s1006_s10  ;;  %p1012_p5 = scmp.lt.s32.totalorder %s1006_s10, %s1006_s10 }
   0xc   :  { %p1013_p6 = por %p1012_p5, %p1011_p4 }
   0xe   :  { %p1014_p7 = pnand %p1013_p6, %p1007_p3 }
  0x10   :  { %1017 = shalt.err (!%p1014_p7)
}
  0x11   :  { %s1091_s11 = smov 256   ;;  %s1092_s12 = smov 16  }
  0x12   :  { %42 = dma.hbm_to_vmem [thread:$0]  %s1220_s3, 4096, %s37_s25, [#allocation6], %s1091_s11, %s1091_s11, %s1092_s12  }
  0x13   :  { %s1093_s15 = smov [#allocation2]   ;;  %s1018_s19 = scalar_lea.hbm %s1217_s0, 256 }
  0x14   :  { %s20_s16 = sshll.u32 %s1093_s15, 4  ;;  %p1019_p8 = scmp.ne.s32.totalorder %s1217_s0, %s1018_s19  ;;  %s21_s16 = int_to_ptr.vmem [resolvable:$true] %s20_s16 }
  0x15   :  { %p1022_p9 = scmp.lt.u32.totalorder %s1018_s19, %s1217_s0 }
  0x17   :  { %p1024_p10 = pnand %p1022_p9, %p1019_p8 }
  0x19   :  { %1027 = shalt.err (!%p1024_p10)
}
  0x1a   :  { %s1028_s24 = scalar_lea.vmem %s21_s16, 256  ;;  %p1033_p12 = scmp.lt.s32.totalorder %s21_s16, %s21_s16 }
  0x1b   :  { %p1029_p11 = scmp.ne.s32.totalorder %s21_s16, %s1028_s24  ;;  %p1034_p13 = scmp.lt.s32.totalorder %s1028_s24, %s1028_s24 }
  0x1d   :  { %p1035_p0 = por %p1034_p13, %p1033_p12 }
  0x1f   :  { %p1036_p1 = pnand %p1035_p0, %p1029_p11 }
  0x21   :  { %1039 = shalt.err (!%p1036_p1)
}
  0x22   :  { %s1094_s3 = smov 128   ;;  %s1095_s25 = smov 8  }
  0x23   :  { %26 = dma.hbm_to_vmem [thread:$0]  %s1217_s0, 256, %s21_s16, [#allocation3], %s1094_s3, %s1094_s3, %s1095_s25  }
  0x24   :  { %s1096_s28 = smov [#allocation7]   ;;  %s1040_s9 = scalar_lea.hbm %s1222_s5, 4096 }
  0x25   :  { %s50_s29 = sshll.u32 %s1096_s28, 4  ;;  %p1041_p2 = scmp.ne.s32.totalorder %s1222_s5, %s1040_s9  ;;  %s51_s29 = int_to_ptr.vmem [resolvable:$true] %s50_s29 }
  0x26   :  { %p1044_p3 = scmp.lt.u32.totalorder %s1040_s9, %s1222_s5 }
  0x28   :  { %p1046_p4 = pnand %p1044_p3, %p1041_p2 }
  0x2a   :  { %1049 = shalt.err (!%p1046_p4)
}
  0x2b   :  { %s1050_s14 = scalar_lea.vmem %s51_s29, 4096  ;;  %p1055_p6 = scmp.lt.s32.totalorder %s51_s29, %s51_s29 }
  0x2c   :  { %p1051_p5 = scmp.ne.s32.totalorder %s51_s29, %s1050_s14  ;;  %p1056_p7 = scmp.lt.s32.totalorder %s1050_s14, %s1050_s14 }
  0x2e   :  { %p1057_p8 = por %p1056_p7, %p1055_p6 }
  0x30   :  { %p1058_p9 = pnand %p1057_p8, %p1051_p5 }
  0x32   :  { %1061 = shalt.err (!%p1058_p9)
}
  0x33   :  { %s1097_s0 = smov 64   ;;  %s1098_s15 = smov 4  }
  0x34   :  { %56 = dma.hbm_to_vmem [thread:$0]  %s1222_s5, 4096, %s51_s29, [#allocation6], %s1097_s0, %s1097_s0, %s1098_s15  }
  0x35   :  { %1084 = dma.done.wait [#allocation3], 256  }
  0x36   :  { %1085 = vsyncadd [#allocation3], 4294967040 }
  0x37   :  { %1086 = dma.done.wait [#allocation6], 8192  }
  0x38   :  { %1087 = vsyncadd [#allocation6], 4294959104  ;;  %v69_v0 = vld [vmem:[#allocation2] sm:$0xff]  ;;  %v70_v1 = vld [vmem:[#allocation2 + $0x8] sm:$0xff]  ;;  %v1099_v36 = vmov 0   ;;  %s1100_s22 = smov [#allocation8]  }
  0x39   :  { %71 = vadd.xlane.f32.xlu0 %v69_v0  ;;  %v912_v2 = vld [vmem:[#allocation5 + $0x4] ss:$16 sps:$4 sm:$0xff]   ;;  %v914_v3 = vld [vmem:[#allocation5 + $0xc] ss:$16 sps:$4 sm:$0xff]   ;;  %v916_v4 = vld [vmem:[#allocation5] ss:$16 sps:$4 sm:$0xff]   ;;  %359 = vmatprep.mubr.bf16.mxu0 %v1099_v36 }
  0x3a   :  { %v917_v5 = vld [vmem:[#allocation5 + $0x8] ss:$16 sps:$4 sm:$0xff]   ;;  %v918_v6 = vld [vmem:[#allocation5 + $0x24] ss:$16 sps:$4 sm:$0xff]   ;;  %v920_v7 = vld [vmem:[#allocation5 + $0x2c] ss:$16 sps:$4 sm:$0xff]   ;;  %327 = vmatprep.subr.bf16.mxu0 %v912_v2  ;;  %370 = vmatprep.subr.bf16.mxu1 %v914_v3 }
  0x3b   :  { %328 = vmatpush1.bf16.msra.mxu0 %v916_v4  ;;  %371 = vmatpush1.bf16.msra.mxu1 %v917_v5  ;;  %v922_v16 = vld [vmem:[#allocation5 + $0x20] ss:$16 sps:$4 sm:$0xff]   ;;  %v923_v17 = vld [vmem:[#allocation5 + $0x28] ss:$16 sps:$4 sm:$0xff]   ;;  %v924_v18 = vld [vmem:[#allocation5 + $0x44] ss:$16 sps:$4 sm:$0xff]  }
  0x3c   :  { %329 = vmatprep.subr.bf16.mxu0 %v918_v6  ;;  %372 = vmatprep.subr.bf16.mxu1 %v920_v7  ;;  %v926_v19 = vld [vmem:[#allocation5 + $0x4c] ss:$16 sps:$4 sm:$0xff]   ;;  %v928_v20 = vld [vmem:[#allocation5 + $0x40] ss:$16 sps:$4 sm:$0xff]   ;;  %v929_v21 = vld [vmem:[#allocation5 + $0x48] ss:$16 sps:$4 sm:$0xff]  }
  0x3d   :  { %73 = vadd.xlane.f32.xlu0 %v70_v1  ;;  %v930_v22 = vld [vmem:[#allocation5 + $0x64] ss:$16 sps:$4 sm:$0xff]   ;;  %v932_v23 = vld [vmem:[#allocation5 + $0x6c] ss:$16 sps:$4 sm:$0xff]   ;;  %v934_v24 = vld [vmem:[#allocation5 + $0x60] ss:$16 sps:$4 sm:$0xff]   ;;  %402 = vmatprep.mubr.bf16.mxu1 %v1099_v36 }
  0x3e   :  { %v935_v25 = vld [vmem:[#allocation5 + $0x68] ss:$16 sps:$4 sm:$0xff]   ;;  %v936_v26 = vld [vmem:[#allocation5 + $0x84] ss:$16 sps:$4 sm:$0xff]   ;;  %v938_v27 = vld [vmem:[#allocation5 + $0x8c] ss:$16 sps:$4 sm:$0xff]  }
  0x3f   :  { %330 = vmatpush1.bf16.msra.mxu0 %v922_v16  ;;  %373 = vmatpush1.bf16.msra.mxu1 %v923_v17  ;;  %v940_v28 = vld [vmem:[#allocation5 + $0x80] ss:$16 sps:$4 sm:$0xff]   ;;  %v941_v29 = vld [vmem:[#allocation5 + $0x88] ss:$16 sps:$4 sm:$0xff]   ;;  %v942_v30 = vld [vmem:[#allocation5 + $0xa4] ss:$16 sps:$4 sm:$0xff]  }
  0x40   :  { %331 = vmatprep.subr.bf16.mxu0 %v924_v18  ;;  %374 = vmatprep.subr.bf16.mxu1 %v926_v19  ;;  %v944_v31 = vld [vmem:[#allocation5 + $0xac] ss:$16 sps:$4 sm:$0xff]   ;;  %v946_v32 = vld [vmem:[#allocation5 + $0xa0] ss:$16 sps:$4 sm:$0xff]   ;;  %v947_v33 = vld [vmem:[#allocation5 + $0xa8] ss:$16 sps:$4 sm:$0xff]  }
  0x41   :  { %v948_v34 = vld [vmem:[#allocation5 + $0xc4] ss:$16 sps:$4 sm:$0xff]   ;;  %v950_v35 = vld [vmem:[#allocation5 + $0xcc] ss:$16 sps:$4 sm:$0xff]   ;;  %v952_v37 = vld [vmem:[#allocation5 + $0xc0] ss:$16 sps:$4 sm:$0xff]  }
  0x42   :  { %v953_v38 = vld [vmem:[#allocation5 + $0xc8] ss:$16 sps:$4 sm:$0xff]   ;;  %v954_v39 = vld [vmem:[#allocation5 + $0xe4] ss:$16 sps:$4 sm:$0xff]   ;;  %v956_v40 = vld [vmem:[#allocation5 + $0xec] ss:$16 sps:$4 sm:$0xff]  }
  0x43   :  { %332 = vmatpush1.bf16.msra.mxu0 %v928_v20  ;;  %375 = vmatpush1.bf16.msra.mxu1 %v929_v21  ;;  %v958_v41 = vld [vmem:[#allocation5 + $0xe0] ss:$16 sps:$4 sm:$0xff]   ;;  %v959_v42 = vld [vmem:[#allocation5 + $0xe8] ss:$16 sps:$4 sm:$0xff]   ;;  %s777_s23 = sshll.u32 %s1100_s22, 4  ;;  %s778_s23 = int_to_ptr.vmem [resolvable:$true] %s777_s23 }
  0x44   :  { %333 = vmatprep.subr.bf16.mxu0 %v930_v22  ;;  %376 = vmatprep.subr.bf16.mxu1 %v932_v23  ;;  %v960_v43 = vld [vmem:[#allocation7 + $0x40] sm:$0xff]   ;;  %v790_v53 = vld [vmem:[%s1218_s1] ss:$0 sm:$0xff]  ;;  %v966_v2 = vld [vmem:[#allocation7 + $0x8] sm:$0xff]   ;;  %p1067_p11 = scmp.lt.s32.totalorder %s778_s23, %s778_s23 }
  0x45   :  { %v961_v44 = vld [vmem:[#allocation7 + $0xc0] sm:$0xff]   ;;  %v791_v57 = vld [vmem:[%s1219_s2] ss:$0 sm:$0xff]  ;;  %v967_v3 = vld [vmem:[#allocation7 + $0x88] sm:$0xff]  }
  0x46   :  { %v962_v61 = vld [vmem:[#allocation7] sm:$0xff]   ;;  %v968_v4 = vld [vmem:[#allocation7 + $0x50] sm:$0xff]   ;;  %v980_v16 = vld [vmem:[#allocation7 + $0x68] sm:$0xff]  }
  0x47   :  { %334 = vmatpush1.bf16.msra.mxu0 %v934_v24  ;;  %377 = vmatpush1.bf16.msra.mxu1 %v935_v25  ;;  %v963_v62 = vld [vmem:[#allocation7 + $0x80] sm:$0xff]   ;;  %v969_v5 = vld [vmem:[#allocation7 + $0xd0] sm:$0xff]   ;;  %v981_v17 = vld [vmem:[#allocation7 + $0xe8] sm:$0xff]  }
  0x48   :  { %335 = vmatprep.subr.bf16.mxu0 %v936_v26  ;;  %378 = vmatprep.subr.bf16.mxu1 %v938_v27  ;;  %v970_v6 = vld [vmem:[#allocation7 + $0x10] sm:$0xff]   ;;  %v982_v18 = vld [vmem:[#allocation7 + $0x28] sm:$0xff]   ;;  %v988_v24 = vld [vmem:[#allocation7 + $0x78] sm:$0xff]  }
  0x49   :  { %v971_v7 = vld [vmem:[#allocation7 + $0x90] sm:$0xff]   ;;  %v983_v19 = vld [vmem:[#allocation7 + $0xa8] sm:$0xff]   ;;  %v989_v25 = vld [vmem:[#allocation7 + $0xf8] sm:$0xff]  }
  0x4a   :  { %v984_v20 = vld [vmem:[#allocation7 + $0x70] sm:$0xff]   ;;  %v990_v26 = vld [vmem:[#allocation7 + $0x38] sm:$0xff]  }
  0x4b   :  { %336 = vmatpush1.bf16.msra.mxu0 %v940_v28  ;;  %379 = vmatpush1.bf16.msra.mxu1 %v941_v29  ;;  %v985_v21 = vld [vmem:[#allocation7 + $0xf0] sm:$0xff]   ;;  %v991_v27 = vld [vmem:[#allocation7 + $0xb8] sm:$0xff]   ;;  %v147_v28 = vlaneseq }
  0x4c   :  { %337 = vmatprep.subr.bf16.mxu0 %v942_v30  ;;  %380 = vmatprep.subr.bf16.mxu1 %v944_v31  ;;  %v986_v22 = vld [vmem:[#allocation7 + $0x30] sm:$0xff]  }
  0x4d   :  { %v987_v23 = vld [vmem:[#allocation7 + $0xb0] sm:$0xff]   ;;  %v148_v29 = vshrl.u32 %v147_v28, 7 }
  0x4f   :  { %338 = vmatpush1.bf16.msra.mxu0 %v946_v32  ;;  %381 = vmatpush1.bf16.msra.mxu1 %v947_v33  ;;  %v149_v30 = vsub.s32 0, %v148_v29  ;;  %v157_v31 = vsub.s32 2, %v148_v29  ;;  %v145_v32 = vld [vmem:[%s1221_s4] sm:$0xf]  ;;  %v153_v33 = vsub.s32 1, %v148_v29 }
  0x50   :  { %339 = vmatprep.subr.bf16.mxu0 %v948_v34  ;;  %382 = vmatprep.subr.bf16.mxu1 %v950_v35  ;;  %v161_v34 = vsub.s32 3, %v148_v29 }
  0x51   :  { %v150_v35 = vrot.slane %v145_v32, %v149_v30  ;;  %v158_v36 = vrot.slane %v145_v32, %v157_v31 }
  0x53   :  { %340 = vmatpush1.bf16.msra.mxu0 %v952_v37  ;;  %383 = vmatpush1.bf16.msra.mxu1 %v953_v38  ;;  %v154_v37 = vrot.slane %v145_v32, %v153_v33  ;;  %v162_v38 = vrot.slane %v145_v32, %v161_v34 }
  0x54   :  { %341 = vmatprep.subr.bf16.mxu0 %v954_v39  ;;  %384 = vmatprep.subr.bf16.mxu1 %v956_v40 }
  0x57   :  { %342 = vmatpush1.bf16.msra.mxu0 %v958_v41  ;;  %385 = vmatpush1.bf16.msra.mxu1 %v959_v42 }
  0x58   :  { %857 = vmatprep.subr.bf16.mxu0 %v960_v43  ;;  %879 = vmatprep.subr.bf16.mxu1 %v961_v44 }
  0xc6   :  { %v72_v8 = vpop.xlane.xlu0 %71 }
  0xc7   :  { %v76_v9 = vmul.f32 0.0078125, %v72_v8  ;;  %v972_v8 = vld [vmem:[#allocation7 + $0x58] sm:$0xff]  }
  0xc9   :  { %v1180_v10 = vsub.f32 %v69_v0, %v76_v9  ;;  %v964_v0 = vld [vmem:[#allocation7 + $0x48] sm:$0xff]   ;;  %v973_v9 = vld [vmem:[#allocation7 + $0xd8] sm:$0xff]  }
  0xca   :  { %v74_v11 = vpop.xlane.xlu0 %73 }
  0xcb   :  { %v77_v12 = vmul.f32 0.0078125, %v74_v11  ;;  %v80_v13 = vmul.f32 %v1180_v10, %v1180_v10  ;;  %v975_v11 = vld [vmem:[#allocation7 + $0x98] sm:$0xff]  }
  0xcd   :  { %v1184_v14 = vsub.f32 %v70_v1, %v77_v12  ;;  %82 = vadd.xlane.f32.xlu1 %v80_v13  ;;  %v965_v1 = vld [vmem:[#allocation7 + $0xc8] sm:$0xff]   ;;  %v976_v12 = vld [vmem:[#allocation7 + $0x60] sm:$0xff]  }
  0xce   :  { %v977_v13 = vld [vmem:[#allocation7 + $0xe0] sm:$0xff]  }
  0xcf   :  { %v81_v15 = vmul.f32 %v1184_v14, %v1184_v14 }
  0xd1   :  { %84 = vadd.xlane.f32.xlu1 %v81_v15  ;;  %v979_v15 = vld [vmem:[#allocation7 + $0xa0] sm:$0xff]  }
 0x15a   :  { %v83_v45 = vpop.xlane.xlu1 %82 }
 0x15b   :  { %v86_v46 = vmul.f32 0.0078125, %v83_v45 }
 0x15d   :  { %v88_v47 = vadd.f32 1e-05, %v86_v46 }
 0x15e   :  { %v85_v48 = vpop.xlane.xlu1 %84 }
 0x15f   :  { %992 = vrsqrt.f32 %v88_v47  ;;  %v87_v49 = vmul.f32 0.0078125, %v85_v48 }
 0x161   :  { %v89_v50 = vadd.f32 1e-05, %v87_v49 }
 0x163   :  { %994 = vrsqrt.f32 %v89_v50 }
 0x169   :  { %v993_v51 = vpop.eup %992 }
 0x16a   :  { %v92_v52 = vmul.f32 %v993_v51, %v1180_v10  ;;  %v974_v10 = vld [vmem:[#allocation7 + $0x18] sm:$0xff]  }
 0x16c   :  { %v101_v56 = vmul.f32 %v790_v53, %v92_v52 }
 0x16d   :  { %v995_v54 = vpop.eup %994 }
 0x16e   :  { %v93_v55 = vmul.f32 %v995_v54, %v1184_v14  ;;  %v110_v59 = vadd.f32 %v791_v57, %v101_v56  ;;  %v978_v14 = vld [vmem:[#allocation7 + $0x20] sm:$0xff]  }
 0x170   :  { %v102_v58 = vmul.f32 %v790_v53, %v93_v55 }
 0x172   :  { %v111_v60 = vadd.f32 %v791_v57, %v102_v58 }
 0x174   :  { %v112_v63 = vpack.c.bf16 %v111_v60, %v110_v59 }
 0x176   :  { %360 = vmatmul.mubr.bf16.vlgmr.msra.gmra.mrb[0].mxu0 %v112_v63  ;;  %403 = vmatmul.mubr.bf16.vlgmr.msra.gmra.mrb[0].mxu1 %v112_v63 }
 0x177   :  { %858 = vmatpush3.bf16.msra.mxu0 %v962_v61  ;;  %880 = vmatpush3.bf16.msra.mxu1 %v963_v62 }
 0x178   :  { %859 = vmatprep.subr.bf16.mxu0 %v964_v0  ;;  %881 = vmatprep.subr.bf16.mxu1 %v965_v1 }
 0x17b   :  { %860 = vmatpush3.bf16.msra.mxu0 %v966_v2  ;;  %882 = vmatpush3.bf16.msra.mxu1 %v967_v3 }
 0x17c   :  { %861 = vmatprep.subr.bf16.mxu0 %v968_v4  ;;  %883 = vmatprep.subr.bf16.mxu1 %v969_v5  ;;  %v824_v5 = vld [vmem:[%s1223_s6] ss:$0 sm:$0xff]  ;;  %s1062_s6 = scalar_lea.vmem %s778_s23, 256 }
 0x17d   :  { %p1063_p10 = scmp.ne.s32.totalorder %s778_s23, %s1062_s6  ;;  %p1068_p12 = scmp.lt.s32.totalorder %s1062_s6, %s1062_s6 }
 0x17f   :  { %862 = vmatpush3.bf16.msra.mxu0 %v970_v6  ;;  %884 = vmatpush3.bf16.msra.mxu1 %v971_v7  ;;  %p1069_p13 = por %p1068_p12, %p1067_p11 }
 0x180   :  { %863 = vmatprep.subr.bf16.mxu0 %v972_v8  ;;  %885 = vmatprep.subr.bf16.mxu1 %v973_v9 }
 0x181   :  { %p1070_p0 = pnand %p1069_p13, %p1063_p10 }
 0x183   :  { %864 = vmatpush3.bf16.msra.mxu0 %v974_v10  ;;  %886 = vmatpush3.bf16.msra.mxu1 %v975_v11 }
 0x184   :  { %865 = vmatprep.subr.bf16.mxu0 %v976_v12  ;;  %887 = vmatprep.subr.bf16.mxu1 %v977_v13 }
 0x187   :  { %866 = vmatpush3.bf16.msra.mxu0 %v978_v14  ;;  %888 = vmatpush3.bf16.msra.mxu1 %v979_v15 }
 0x188   :  { %867 = vmatprep.subr.bf16.mxu0 %v980_v16  ;;  %889 = vmatprep.subr.bf16.mxu1 %v981_v17 }
 0x18b   :  { %868 = vmatpush3.bf16.msra.mxu0 %v982_v18  ;;  %890 = vmatpush3.bf16.msra.mxu1 %v983_v19 }
 0x18c   :  { %869 = vmatprep.subr.bf16.mxu0 %v984_v20  ;;  %891 = vmatprep.subr.bf16.mxu1 %v985_v21 }
 0x18f   :  { %870 = vmatpush3.bf16.msra.mxu0 %v986_v22  ;;  %892 = vmatpush3.bf16.msra.mxu1 %v987_v23 }
 0x190   :  { %871 = vmatprep.subr.bf16.mxu0 %v988_v24  ;;  %893 = vmatprep.subr.bf16.mxu1 %v989_v25 }
 0x193   :  { %872 = vmatpush3.bf16.msra.mxu0 %v990_v26  ;;  %894 = vmatpush3.bf16.msra.mxu1 %v991_v27 }
 0x249   :  { %v361_v39 = vpop.f32.mrb[0].mxu0  ;;  %v404_v40 = vpop.f32.mrb[0].mxu1 }
 0x24a   :  { %v362_v41 = vadd.f32 %v361_v39, %v150_v35  ;;  %v405_v42 = vadd.f32 %v404_v40, %v158_v36  ;;  %v363_v43 = vpop.f32.mrb[1].mxu0  ;;  %v406_v44 = vpop.f32.mrb[1].mxu1 }
 0x24b   :  { %v364_v45 = vadd.f32 %v363_v43, %v154_v37  ;;  %v407_v46 = vadd.f32 %v406_v44, %v162_v38  ;;  %v365_v47 = vpop.f32.mrb[2].mxu0  ;;  %v408_v48 = vpop.f32.mrb[2].mxu1 }
 0x24c   :  { %v366_v49 = vadd.f32 %v365_v47, %v150_v35  ;;  %v409_v50 = vadd.f32 %v408_v48, %v158_v36  ;;  %v367_v51 = vpop.f32.mrb[3].mxu0  ;;  %v410_v52 = vpop.f32.mrb[3].mxu1  ;;  %v413_v55 = vmax.f32 %v362_v41, 0.0  ;;  %v415_v56 = vmax.f32 %v405_v42, 0.0 }
 0x24d   :  { %v368_v53 = vadd.f32 %v367_v51, %v154_v37  ;;  %v411_v54 = vadd.f32 %v410_v52, %v162_v38  ;;  %v414_v59 = vmax.f32 %v364_v45, 0.0  ;;  %v416_v60 = vmax.f32 %v407_v46, 0.0 }
 0x24e   :  { %v417_v57 = vmax.f32 %v366_v49, 0.0  ;;  %v419_v58 = vmax.f32 %v409_v50, 0.0 }
 0x24f   :  { %v418_v61 = vmax.f32 %v368_v53, 0.0  ;;  %v420_v62 = vmax.f32 %v411_v54, 0.0 }
 0x250   :  { %v421_v63 = vpack.c.bf16 %v417_v57, %v413_v55  ;;  %v423_v0 = vpack.c.bf16 %v419_v58, %v415_v56 }
 0x251   :  { %v422_v1 = vpack.c.bf16 %v418_v61, %v414_v59  ;;  %v424_v2 = vpack.c.bf16 %v420_v62, %v416_v60 }
 0x253   :  { %720 = vmatprep.mubr.bf16.mxu0 %v422_v1  ;;  %761 = vmatprep.mubr.bf16.mxu1 %v424_v2 }
 0x254   :  { %721 = vmatmul.mubr.bf16.vlgmr.msra.gmra.mrb[4].mxu0 %v421_v63  ;;  %762 = vmatmul.mubr.bf16.vlgmr.msra.gmra.mrb[4].mxu1 %v423_v0 }
 0x327   :  { %v873_v3 = vpop.f32.mrb[4].mxu0  ;;  %v895_v4 = vpop.f32.mrb[4].mxu1 }
 0x328   :  { %v874_v6 = vpop.f32.mrb[5].mxu0  ;;  %v896_v7 = vpop.f32.mrb[5].mxu1 }
 0x329   :  { %v875_v8 = vadd.f32 %v874_v6, %v873_v3  ;;  %v897_v9 = vadd.f32 %v896_v7, %v895_v4  ;;  %v876_v10 = vpop.f32.mrb[6].mxu0  ;;  %v898_v11 = vpop.f32.mrb[6].mxu1 }
 0x32a   :  { %v877_v12 = vpop.f32.mrb[7].mxu0  ;;  %v899_v13 = vpop.f32.mrb[7].mxu1 }
 0x32b   :  { %v723_v14 = vadd.f32 %v875_v8, %v824_v5  ;;  %v878_v15 = vadd.f32 %v877_v12, %v876_v10  ;;  %v900_v16 = vadd.f32 %v899_v13, %v898_v11 }
 0x32d   :  { %v764_v17 = vadd.f32 %v897_v9, %v723_v14  ;;  %v726_v18 = vadd.f32 %v878_v15, %v824_v5 }
 0x32f   :  { %770 = vst [vmem:[#allocation8] sm:$0xff] %v764_v17  ;;  %v767_v19 = vadd.f32 %v900_v16, %v726_v18 }
 0x331   :  { %771 = vst [vmem:[#allocation8 + $0x8] sm:$0xff] %v767_v19 }
 0x332   :  { %1073 = shalt.err (!%p1070_p0)
}
 0x333   :  { %s1074_s27 = scalar_lea.hbm %s1224_s7, 256 }
 0x334   :  { %p1075_p1 = scmp.ne.s32.totalorder %s1224_s7, %s1074_s27  ;;  %p1078_p2 = scmp.lt.u32.totalorder %s1074_s27, %s1224_s7 }
 0x336   :  { %p1080_p3 = pnand %p1078_p2, %p1075_p1 }
 0x338   :  { %1083 = shalt.err (!%p1080_p3)
}
 0x339   :  { %783 = dma.vmem_to_hbm [thread:$0]  %s778_s23, 256, %s1224_s7, [#allocation4], %s1094_s3, %s1094_s3, %s1095_s25  }
 0x33a   :  { %1088 = dma.done.wait [#allocation4], 256  }
 0x33b   :  { %1089 = vsyncadd [#allocation4], 4294967040 }
 0x33c   :  { %787 = vsyncpa [#allocation3], 1 }
 0x33d   :  { %788 = vsyncpa [#allocation6], 1 }
 0x33e   :  { %789 = vsyncpa [#allocation4], 1 }

</bundles_post_ra>
